<compile_context>
chip_gen: v7x
topology: tpu7x:2x2x1
jax: 0.10.0
libtpu: 0.0.40
codegen_flags: <defaults>
</compile_context>

<pallas_src>
import functools

import jax
import jax.numpy as jnp
from jax.experimental import pallas as pl
from jax.experimental.pallas import tpu as pltpu


def _dot_bias_kernel(idx_ref, sfa_ref, pfa_ref, o_ref, *, y_lo, y_hi):
    # idx_ref: (2, TB) int32   row 0 = sample ids, row 1 = peptide ids
    # sfa_ref: (D+2, Ns) f32   augmented sample table (factors; bias; ones)
    # pfa_ref: (D+2, Np) f32   augmented peptide table (factors; ones; bias)
    # o_ref  : (1, TB)  f32    lane-dense output tile
    tb = idx_ref.shape[1]
    n_samples = sfa_ref.shape[1]
    n_peptides = pfa_ref.shape[1]

    idx_s = idx_ref[0:1, :]                                   # (1, TB)
    idx_p = idx_ref[1:2, :]                                   # (1, TB)

    # One-hot gather matrices: oh[n, b] = (idx[b] == n).
    iota_s = jax.lax.broadcasted_iota(jnp.int32, (n_samples, tb), 0)
    iota_p = jax.lax.broadcasted_iota(jnp.int32, (n_peptides, tb), 0)
    oh_s = jnp.where(iota_s == idx_s, 1.0, 0.0).astype(jnp.float32)
    oh_p = jnp.where(iota_p == idx_p, 1.0, 0.0).astype(jnp.float32)

    # Gather rows (transposed) on the MXU: (D+2, N) @ (N, TB) -> (D+2, TB).
    s = jnp.dot(sfa_ref[...], oh_s, preferred_element_type=jnp.float32)
    p = jnp.dot(pfa_ref[...], oh_p, preferred_element_type=jnp.float32)

    # Sublane reduce over D+2: dot product + sample bias + peptide bias.
    res = jnp.sum(s * p, axis=0, keepdims=True)               # (1, TB)

    # sigmoid_range(res, y_lo, y_hi)
    o_ref[...] = jax.nn.sigmoid(res) * (y_hi - y_lo) + y_lo


def dot_product_bias(x, sample_factors, sample_bias, peptide_factors, peptide_bias,
                     y_range=(14.0, 30.0), tile_b=512):
    """Forward pass of DotProductBias.

    x: (B, 2) int32 indices -> column 0 indexes samples, column 1 indexes peptides.
    Returns (B, 1) float32.
    """
    B = x.shape[0]
    n_samples, dim = sample_factors.shape
    n_peptides, _ = peptide_factors.shape

    # Tiny one-time glue: augmented, transposed tables so the bias add folds
    # into the factor dot product (see header comment).
    sfa = jnp.concatenate(
        [sample_factors.T, sample_bias.T, jnp.ones((1, n_samples), jnp.float32)],
        axis=0).astype(jnp.float32)                            # (D+2, Ns)
    pfa = jnp.concatenate(
        [peptide_factors.T, jnp.ones((1, n_peptides), jnp.float32), peptide_bias.T],
        axis=0).astype(jnp.float32)                            # (D+2, Np)

    # Batch tile: multiple of 128 lanes, capped by tile_b, shrunk for tiny B.
    tb = max(128, min(int(tile_b), 128 * pl.cdiv(B, 128)))
    n_tiles = pl.cdiv(B, tb)
    b_pad = n_tiles * tb

    # Indices with batch on the lane axis; pad tail with valid index 0.
    idx = x.astype(jnp.int32).T                                # (2, B)
    idx = jnp.pad(idx, ((0, 0), (0, b_pad - B)))               # (2, B_pad)

    kernel = functools.partial(_dot_bias_kernel,
                               y_lo=float(y_range[0]), y_hi=float(y_range[1]))

    out = pl.pallas_call(
        kernel,
        out_shape=jax.ShapeDtypeStruct((1, b_pad), jnp.float32),
        grid_spec=pltpu.PrefetchScalarGridSpec(
            num_scalar_prefetch=0,
            grid=(n_tiles,),
            in_specs=[
                # Per-tile batch indices (streamed, double-buffered).
                pl.BlockSpec((2, tb), lambda i: (0, i)),
                # Whole tables, constant block index -> DMA'd once, VMEM-resident.
                pl.BlockSpec((dim + 2, n_samples), lambda i: (0, 0)),
                pl.BlockSpec((dim + 2, n_peptides), lambda i: (0, 0)),
            ],
            out_specs=pl.BlockSpec((1, tb), lambda i: (0, i)),
        ),
        compiler_params=pltpu.CompilerParams(
            dimension_semantics=("parallel",)),
    )(idx, sfa, pfa)

    return out[:, :B].reshape(B, 1)


def reference(x, sample_factors, sample_bias, peptide_factors, peptide_bias,
              y_range=(14.0, 30.0)):
    sf = sample_factors[x[:, 0]]
    pf = peptide_factors[x[:, 1]]
    res = jnp.sum(sf * pf, axis=1, keepdims=True)
    res = res + sample_bias[x[:, 0]] + peptide_bias[x[:, 1]]
    lo, hi = y_range
    return jax.nn.sigmoid(res) * (hi - lo) + lo


if __name__ == "__main__":
    # Deterministic synthetic parameters (module __init__ shapes).
    n_samples, n_peptides, dim_latent = 10, 20, 32
    batch = 8
    y_range = (14.0, 30.0)

    key = jax.random.PRNGKey(0)
    k1, k2, k3, k4, k5, k6 = jax.random.split(key, 6)

    sample_factors = jax.random.normal(k1, (n_samples, dim_latent), jnp.float32) * 0.1
    sample_bias = jax.random.normal(k2, (n_samples, 1), jnp.float32) * 0.1
    peptide_factors = jax.random.normal(k3, (n_peptides, dim_latent), jnp.float32) * 0.1
    peptide_bias = jax.random.normal(k4, (n_peptides, 1), jnp.float32) * 0.1

    # x: (B, 2) integer indices [sample_idx, peptide_idx]
    x = jnp.stack(
        [jax.random.randint(k5, (batch,), 0, n_samples),
         jax.random.randint(k6, (batch,), 0, n_peptides)],
        axis=1).astype(jnp.int32)

    out = dot_product_bias(x, sample_factors, sample_bias,
                           peptide_factors, peptide_bias, y_range)
    out = jax.block_until_ready(out)

    ref = reference(x, sample_factors, sample_bias,
                    peptide_factors, peptide_bias, y_range)

    assert out.shape == (batch, 1), out.shape
    assert jnp.allclose(out, ref, atol=1e-5, rtol=1e-5), (out, ref)
    print("KERNEL_OK")
</pallas_src>

<mosaic_0001>
module attributes {stable_mosaic.version = 11 : i64} {
  func.func @_dot_bias_kernel(%arg0: i32, %arg1: memref<2x128xi32, #tpu.memory_space<vmem>>, %arg2: memref<34x10xf32, #tpu.memory_space<vmem>>, %arg3: memref<34x20xf32, #tpu.memory_space<vmem>>, %arg4: memref<1x128xf32, #tpu.memory_space<vmem>>) attributes {dimension_semantics = [#tpu.dimension_semantics<parallel>], iteration_bounds = array<i64: 1>, scalar_prefetch = 0 : i64, scratch_operands = 0 : i64, tpu.core_type = #tpu.core_type<tc>, window_params = [{transform_indices = @transform_0, window_bounds = array<i64: 2, 128>}, {pipeline_mode = #tpu.pipeline_mode<synchronous>, transform_indices = @transform_1, window_bounds = array<i64: 34, 10>}, {pipeline_mode = #tpu.pipeline_mode<synchronous>, transform_indices = @transform_2, window_bounds = array<i64: 34, 20>}, {transform_indices = @transform_3, window_bounds = array<i64: 1, 128>}]} {
    %c0 = arith.constant 0 : index
    %c0_0 = arith.constant 0 : index
    %0 = vector.load %arg1[%c0, %c0_0] : memref<2x128xi32, #tpu.memory_space<vmem>>, vector<1x128xi32>
    %c1 = arith.constant 1 : index
    %c0_1 = arith.constant 0 : index
    %1 = vector.load %arg1[%c1, %c0_1] : memref<2x128xi32, #tpu.memory_space<vmem>>, vector<1x128xi32>
    %2 = tpu.iota {dimensions = array<i32: 0>} : vector<10x128xi32>
    %3 = tpu.iota {dimensions = array<i32: 0>} : vector<20x128xi32>
    %4 = vector.broadcast %0 : vector<1x128xi32> to vector<10x128xi32>
    %5 = arith.cmpi eq, %2, %4 : vector<10x128xi32>
    %cst = arith.constant 1.000000e+00 : f32
    %cst_2 = arith.constant 0.000000e+00 : f32
    %6 = vector.broadcast %cst : f32 to vector<10x128xf32>
    %7 = vector.broadcast %cst_2 : f32 to vector<10x128xf32>
    %8 = arith.select %5, %6, %7 : vector<10x128xi1>, vector<10x128xf32>
    %9 = vector.broadcast %1 : vector<1x128xi32> to vector<20x128xi32>
    %10 = arith.cmpi eq, %3, %9 : vector<20x128xi32>
    %cst_3 = arith.constant 1.000000e+00 : f32
    %cst_4 = arith.constant 0.000000e+00 : f32
    %11 = vector.broadcast %cst_3 : f32 to vector<20x128xf32>
    %12 = vector.broadcast %cst_4 : f32 to vector<20x128xf32>
    %13 = arith.select %10, %11, %12 : vector<20x128xi1>, vector<20x128xf32>
    %c0_5 = arith.constant 0 : index
    %c0_6 = arith.constant 0 : index
    %14 = vector.load %arg2[%c0_5, %c0_6] : memref<34x10xf32, #tpu.memory_space<vmem>>, vector<34x10xf32>
    %cst_7 = arith.constant dense<0.000000e+00> : vector<34x128xf32>
    %15 = tpu.matmul %14, %8, %cst_7 {dimension_numbers = #tpu.dot_dimension_numbers<[1], [0], [0], [1], [0, 0, 1, 1], [], []>} : vector<34x10xf32>, vector<10x128xf32>, vector<34x128xf32> -> vector<34x128xf32>
    %c0_8 = arith.constant 0 : index
    %c0_9 = arith.constant 0 : index
    %16 = vector.load %arg3[%c0_8, %c0_9] : memref<34x20xf32, #tpu.memory_space<vmem>>, vector<34x20xf32>
    %cst_10 = arith.constant dense<0.000000e+00> : vector<34x128xf32>
    %17 = tpu.matmul %16, %13, %cst_10 {dimension_numbers = #tpu.dot_dimension_numbers<[1], [0], [0], [1], [0, 0, 1, 1], [], []>} : vector<34x20xf32>, vector<20x128xf32>, vector<34x128xf32> -> vector<34x128xf32>
    %18 = arith.mulf %15, %17 : vector<34x128xf32>
    %cst_11 = arith.constant dense<0.000000e+00> : vector<128xf32>
    %19 = vector.multi_reduction <add>, %18, %cst_11 [0] : vector<34x128xf32> to vector<128xf32>
    %20 = vector.shape_cast %19 : vector<128xf32> to vector<1x128xf32>
    %21 = arith.negf %20 : vector<1x128xf32>
    %22 = math.exp %21 : vector<1x128xf32>
    %cst_12 = arith.constant 1.000000e+00 : f32
    %23 = vector.broadcast %cst_12 : f32 to vector<1x128xf32>
    %24 = arith.addf %23, %22 : vector<1x128xf32>
    %25 = arith.divf %23, %24 : vector<1x128xf32>
    %cst_13 = arith.constant 1.600000e+01 : f32
    %26 = vector.broadcast %cst_13 : f32 to vector<1x128xf32>
    %27 = arith.mulf %25, %26 : vector<1x128xf32>
    %cst_14 = arith.constant 1.400000e+01 : f32
    %28 = vector.broadcast %cst_14 : f32 to vector<1x128xf32>
    %29 = arith.addf %27, %28 : vector<1x128xf32>
    %c0_15 = arith.constant 0 : index
    %c0_16 = arith.constant 0 : index
    %30 = vector.load %arg4[%c0_15, %c0_16] : memref<1x128xf32, #tpu.memory_space<vmem>>, vector<1x128xf32>
    tpu.vector_store %arg4[%c0_15, %c0_16], %29 {strides = array<i32>} : memref<1x128xf32, #tpu.memory_space<vmem>>, vector<1x128xf32>,
    return
  }
  func.func @transform_0(%arg0: i32) -> (i32, i32) {
    %c0_i32 = arith.constant 0 : i32
    %c0_i32_0 = arith.constant 0 : i32
    return %c0_i32, %arg0 : i32, i32
  }
  func.func @transform_1(%arg0: i32) -> (i32, i32) {
    %c0_i32 = arith.constant 0 : i32
    %c0_i32_0 = arith.constant 0 : i32
    %c0_i32_1 = arith.constant 0 : i32
    return %c0_i32, %c0_i32_0 : i32, i32
  }
  func.func @transform_2(%arg0: i32) -> (i32, i32) {
    %c0_i32 = arith.constant 0 : i32
    %c0_i32_0 = arith.constant 0 : i32
    %c0_i32_1 = arith.constant 0 : i32
    return %c0_i32, %c0_i32_0 : i32, i32
  }
  func.func @transform_3(%arg0: i32) -> (i32, i32) {
    %c0_i32 = arith.constant 0 : i32
    %c0_i32_0 = arith.constant 0 : i32
    return %c0_i32, %arg0 : i32, i32
  }
}

</mosaic_0001>

<bundles_post_ra>
// kernel: tpu_custom_call.1
= control target key start
LH: loop header
LB: loop body
LE: loop exit
PB: predicated region body
PF: predicated region fallthrough
CT: control target
= control target key end

     0   :  { %v17_v0 = vlaneseq  ;;  %v422_v1 = vmov 0.0|0.0   ;;  %vm60_vm0 = vcmask 1041408   ;;  %vm423_vm1 = vmmov 0   ;;  %s518_s0 = inlined_call_operand.vmem [shape: s32[2,128], index: 0, kind: input, shape index: {}]   ;;  %s519_s1 = inlined_call_operand.vmem [shape: f32[34,10], index: 1, kind: input, shape index: {}]   ;;  %s520_s2 = inlined_call_operand.vmem [shape: f32[34,20], index: 2, kind: input, shape index: {}]   ;;  %s521_s3 = inlined_call_operand.hbm [shape: f32[1,128], index: 3, kind: output, shape index: {}]  }
   0x1   :  { %385 = vmatprep.subr.bf16.mxu1 %v422_v1  ;;  %v309_v2 = vld [vmem:[%s518_s0 + $0x1] ss:$0 sm:$0xff]  ;;  %381 = vmatprep.subr.bf16.mxu0 %v422_v1  ;;  %v424_v4 = vmov 0.0   ;;  %v308_v5 = vld [vmem:[%s518_s0] ss:$0 sm:$0xff] }
   0x2   :  { %v18_v3 = vshrl.u32 %v17_v0, 7  ;;  %345 = vmatprep.mubr.msk.f32.mxu0 %vm423_vm1, %v424_v4  ;;  %366 = vmatprep.mubr.msk.f32.mxu1 %vm423_vm1, %v424_v4 }
   0x4   :  { %v19_v6 = vadd.s32 8, %v18_v3  ;;  %vm33_vm2 = vcmp.eq.s32.totalorder %v18_v3, %v309_v2  ;;  %vm25_vm3 = vcmp.eq.s32.totalorder %v18_v3, %v308_v5  ;;  %v20_v7 = vadd.s32 16, %v18_v3 }
   0x5   :  { %vm383_vm4 = vmpackc.low %vm60_vm0, %vm25_vm3 }
   0x6   :  { %vm34_vm5 = vcmp.eq.s32.totalorder %v19_v6, %v309_v2  ;;  %vm26_vm6 = vcmp.eq.s32.totalorder %v19_v6, %v308_v5  ;;  %vm35_vm7 = vcmp.eq.s32.totalorder %v20_v7, %v309_v2 }
   0x7   :  { %8 = vsyncpa [#allocation3], 0  ;;  %v28_v8 = vsel %vm26_vm6, 1.0, %v424_v4  ;;  %v425_v9 = vmov 1.0|1.0   ;;  %v426_v10 = vmov 1.0  }
   0x8   :  { %vm386_vm8 = vmpackc.low %vm34_vm5, %vm33_vm2  ;;  %v382_v11 = vpack.c.bf16 %v28_v8, %v426_v10  ;;  %v38_v12 = vsel %vm35_vm7, 1.0, %v424_v4  ;;  %vm175_vm9 = vcmask 1043456   ;;  %v39_v13 = vld [vmem:[%s519_s1] sm:$0xff]  ;;  %vm44_vm10 = vcmask 80896   ;;  %v40_v15 = vld [vmem:[%s519_s1 + $0x8] sm:$0xff] }
   0x9   :  { %387 = vmatpush3.bf16.msk.msra.mxu1 %vm386_vm8, %v425_v9  ;;  %v154_v14 = vld [vmem:[%s520_s2] sm:$0xff]  ;;  %vm159_vm11 = vcmask 162816   ;;  %v155_v16 = vld [vmem:[%s520_s2 + $0x8] sm:$0xff]  ;;  %v41_v17 = vld [vmem:[%s519_s1 + $0x10] sm:$0xff] }
   0xa   :  { %364 = vmatprep.subr.mxu1 %v424_v4  ;;  %384 = vmatpush3.bf16.msk.msra.mxu0 %vm383_vm4, %v382_v11  ;;  %v156_v18 = vld [vmem:[%s520_s2 + $0x10] sm:$0xff]  ;;  %v42_v19 = vld [vmem:[%s519_s1 + $0x18] sm:$0xff]  ;;  %v43_v21 = vld [vmem:[%s519_s1 + $0x20] sm:$0x3]  ;;  %s427_s1 = smov [#allocation2]  }
   0xb   :  { %v157_v20 = vld [vmem:[%s520_s2 + $0x18] sm:$0xff]  ;;  %v158_v22 = vld [vmem:[%s520_s2 + $0x20] sm:$0x3]  ;;  %s300_s2 = sshll.u32 %s427_s1, 4  ;;  %s301_s2 = int_to_ptr.vmem [resolvable:$true] %s300_s2 }
   0xc   :  { %s398_s8 = scalar_lea.vmem %s301_s2, 16  ;;  %s402_s9 = scalar_lea.vmem %s301_s2, 32 }
   0xd   :  { %365 = vmatpush3.msk.msra.mxu1 %vm175_vm9, %v38_v12  ;;  %346 = vmatmul.mubr.msk.f32.vlgmr.msra.gmra.mrb[0].mxu0 %vm44_vm10, %v39_v13  ;;  %p399_p0 = scmp.ne.s32.totalorder %s301_s2, %s398_s8  ;;  %p403_p1 = scmp.lt.s32.totalorder %s301_s2, %s301_s2 }
   0xe   :  { %367 = vmatmul.mubr.msk.f32.vlgmr.msra.gmra.mrb[0].mxu1 %vm159_vm11, %v154_v14  ;;  %348 = vmatprep.mubr.msk.f32.mxu0 %vm423_vm1, %v424_v4  ;;  %p404_p2 = scmp.lt.s32.totalorder %s402_s9, %s398_s8 }
   0xf   :  { %369 = vmatprep.mubr.msk.f32.mxu1 %vm423_vm1, %v424_v4 }
  0x10   :  { %p405_p3 = por %p404_p2, %p403_p1 }
  0x11   :  { %349 = vmatmul.mubr.msk.f32.gmra.mrb[2].mxu0 %vm44_vm10, %v40_v15 }
  0x12   :  { %370 = vmatmul.mubr.msk.f32.gmra.mrb[2].mxu1 %vm159_vm11, %v155_v16  ;;  %351 = vmatprep.mubr.msk.f32.mxu0 %vm423_vm1, %v424_v4  ;;  %p406_p4 = pnand %p405_p3, %p399_p0 }
  0x13   :  { %372 = vmatprep.mubr.msk.f32.mxu1 %vm423_vm1, %v424_v4 }
  0x15   :  { %352 = vmatmul.mubr.msk.f32.gmra.mrb[4].mxu0 %vm44_vm10, %v41_v17 }
  0x16   :  { %373 = vmatmul.mubr.msk.f32.gmra.mrb[4].mxu1 %vm159_vm11, %v156_v18  ;;  %354 = vmatprep.mubr.msk.f32.mxu0 %vm423_vm1, %v424_v4 }
  0x17   :  { %375 = vmatprep.mubr.msk.f32.mxu1 %vm423_vm1, %v424_v4 }
  0x19   :  { %355 = vmatmul.mubr.msk.f32.gmra.mrb[6].mxu0 %vm44_vm10, %v42_v19 }
  0x1a   :  { %376 = vmatmul.mubr.msk.f32.gmra.mrb[6].mxu1 %vm159_vm11, %v157_v20  ;;  %357 = vmatprep.mubr.msk.f32.mxu0 %vm423_vm1, %v424_v4 }
  0x1b   :  { %378 = vmatprep.mubr.msk.f32.mxu1 %vm423_vm1, %v424_v4 }
  0x1d   :  { %358 = vmatmul.mubr.msk.f32.gmra.mrb[8].mxu0 %vm44_vm10, %v43_v21 }
  0x1e   :  { %379 = vmatmul.mubr.msk.f32.gmra.mrb[8].mxu1 %vm159_vm11, %v158_v22 }
  0xe0   :  { %v130_v23 = vpop.f32.mrb[0].mxu0 }
  0xe1   :  { %v245_v24 = vpop.f32.mrb[0].mxu1  ;;  %v347_v26 = vpop.f32.mrb[1].mxu0 }
  0xe2   :  { %v269_v25 = vmul.f32 %v245_v24, %v130_v23  ;;  %v368_v27 = vpop.f32.mrb[1].mxu1 }
  0xe4   :  { %v135_v28 = vpop.f32.mrb[2].mxu0 }
  0xe5   :  { %v250_v29 = vpop.f32.mrb[2].mxu1  ;;  %v350_v31 = vpop.f32.mrb[3].mxu0 }
  0xe6   :  { %v270_v30 = vmul.f32 %v250_v29, %v135_v28  ;;  %v371_v32 = vpop.f32.mrb[3].mxu1 }
  0xe8   :  { %v274_v33 = vadd.f32 %v270_v30, %v269_v25  ;;  %v140_v34 = vpop.f32.mrb[4].mxu0 }
  0xe9   :  { %v255_v35 = vpop.f32.mrb[4].mxu1  ;;  %v353_v37 = vpop.f32.mrb[5].mxu0 }
  0xea   :  { %v271_v36 = vmul.f32 %v255_v35, %v140_v34  ;;  %v374_v38 = vpop.f32.mrb[5].mxu1 }
  0xec   :  { %v275_v39 = vadd.f32 %v274_v33, %v271_v36  ;;  %v145_v40 = vpop.f32.mrb[6].mxu0 }
  0xed   :  { %v260_v41 = vpop.f32.mrb[6].mxu1  ;;  %v356_v43 = vpop.f32.mrb[7].mxu0 }
  0xee   :  { %v272_v42 = vmul.f32 %v260_v41, %v145_v40  ;;  %v377_v44 = vpop.f32.mrb[7].mxu1 }
  0xf0   :  { %v276_v45 = vadd.f32 %v275_v39, %v272_v42  ;;  %v150_v46 = vpop.f32.mrb[8].mxu0 }
  0xf1   :  { %v265_v47 = vpop.f32.mrb[8].mxu1  ;;  %v359_v49 = vpop.f32.mrb[9].mxu0 }
  0xf2   :  { %v273_v48 = vmul.f32 %v265_v47, %v150_v46  ;;  %v380_v50 = vpop.f32.mrb[9].mxu1 }
  0xf4   :  { %v277_v51 = vsel %vm60_vm0, %v273_v48, 0.0 }
  0xf5   :  { %v278_v52 = vadd.f32 %v277_v51, %v276_v45 }
  0xf7   :  { %v279_v53 = vrot.slane %v278_v52, 4 }
  0xf9   :  { %v280_v54 = vadd.f32 %v279_v53, %v278_v52 }
  0xfb   :  { %v281_v55 = vrot.slane %v280_v54, 2 }
  0xfd   :  { %v282_v56 = vadd.f32 %v281_v55, %v280_v54 }
  0xff   :  { %v283_v57 = vrot.slane %v282_v56, 1 }
 0x101   :  { %v284_v58 = vadd.f32 %v283_v57, %v282_v56 }
 0x103   :  { %v325_v59 = vmul.f32 -1.442695, %v284_v58 }
 0x105   :  { %394 = vpow2.f32 %v325_v59 }
 0x10f   :  { %v395_v60 = vpop.eup %394 }
 0x110   :  { %v288_v61 = vadd.f32 1.0, %v395_v60 }
 0x112   :  { %396 = vrcp.f32 %v288_v61 }
 0x11c   :  { %v397_v62 = vpop.eup %396 }
 0x11d   :  { %v291_v63 = vmul.f32 16.0, %v397_v62 }
 0x11f   :  { %v292_v0 = vadd.f32 14.0, %v291_v63 }
 0x121   :  { %293 = vst [vmem:[#allocation2] sm:$0x1] %v292_v0 }
 0x122   :  { %409 = shalt.err (!%p406_p4)
}
 0x123   :  { %s410_s12 = scalar_lea.hbm %s521_s3, 16 }
 0x124   :  { %p411_p5 = scmp.ne.s32.totalorder %s521_s3, %s410_s12  ;;  %p414_p6 = scmp.lt.u32.totalorder %s410_s12, %s521_s3 }
 0x126   :  { %p416_p7 = pnand %p414_p6, %p411_p5 }
 0x128   :  { %419 = shalt.err (!%p416_p7)
}
 0x129   :  { %303 = dma.vmem_to_hbm [thread:$0]  %s301_s2, 16, %s521_s3, [#allocation3]  }
 0x12a   :  { %420 = dma.done.wait [#allocation3], 16  }
 0x12b   :  { %421 = vsyncadd [#allocation3], 4294967280 }
 0x12c   :  { %307 = vsyncpa [#allocation3], 1 }

</bundles_post_ra>
